<compile_context>
chip_gen: v6e
topology: v6e:2x2x1
jax: 0.10.0
libtpu: 0.0.40
codegen_flags: <defaults>
</compile_context>

<pallas_src>
import jax
import jax.numpy as jnp
from jax.experimental import pallas as pl
from jax.experimental.pallas import tpu as pltpu

BN_EPS = 1e-5
LANE = 128


def _round_up(x, m):
    return ((x + m - 1) // m) * m


# ----------------------------- kernel ---------------------------------------

def _dense_relu(h_bf16, w_bf16, b_f32):
    """(TILE_B, K) bf16 @ (K, 128) bf16 -> f32 acc, +bias, ReLU, back to bf16."""
    y = jnp.dot(h_bf16, w_bf16, preferred_element_type=jnp.float32)
    return jnp.maximum(y + b_f32, 0.0).astype(jnp.bfloat16)


def fcmodel_kernel(x_ref, w1_ref, ws_ref, bs_ref, wf_ref, bo_ref, out_ref):
    h = x_ref[...]                                  # (TILE_B, n_in) bf16
    h = _dense_relu(h, w1_ref[...], bs_ref[0])      # f_fc1 (+f_bn1) -> lanes [0,100)
    h = _dense_relu(h, ws_ref[0], bs_ref[1])        # f_fc2 (+f_bn2) -> lanes [0,80)
    feat = _dense_relu(h, ws_ref[1], bs_ref[2])     # f_fc3 (+f_bn3) -> lanes [0,60)
    # ReverseLayerF.apply(feature, alpha) == identity in the forward pass.
    # Fused head entry: class c_fc1 -> lanes [0,40), domain d_fc1 -> lanes [40,80).
    head = _dense_relu(feat, ws_ref[2], bs_ref[3])
    hc2 = _dense_relu(head, ws_ref[3], bs_ref[4])   # c_fc2 (+c_bn2) -> lanes [0,20)
    # Fused final matmul: merged operand takes hc2 in lanes [0,40) (nonzero only
    # in [0,20)) and head in lanes [40,128) (d_fc1 output in [40,80)). Rows
    # [20,40) and [80,128) of wf are zero, so stale lanes cannot leak. No ReLU:
    # class / domain logits are unrectified.
    lane = jax.lax.broadcasted_iota(jnp.int32, hc2.shape, 1)
    merged = jnp.where(lane < 40, hc2, head)
    out = jnp.dot(merged, wf_ref[...], preferred_element_type=jnp.float32) + bo_ref[...]
    out_ref[...] = out                              # (TILE_B, out_w) f32


# ------------------------- parameter packing --------------------------------

def init_raw_params(key, n_in, n_classes):
    """Deterministic PyTorch-like init (Linear uniform, non-trivial BN stats)."""
    def linear(k, din, dout):
        k1, k2 = jax.random.split(k)
        bound = 1.0 / (din ** 0.5)
        W = jax.random.uniform(k1, (din, dout), jnp.float32, -bound, bound)
        b = jax.random.uniform(k2, (dout,), jnp.float32, -bound, bound)
        return W, b

    def bn(k, d):
        k1, k2, k3, k4 = jax.random.split(k, 4)
        return (1.0 + 0.1 * jax.random.normal(k1, (d,), jnp.float32),           # gamma
                0.1 * jax.random.normal(k2, (d,), jnp.float32),                 # beta
                0.1 * jax.random.normal(k3, (d,), jnp.float32),                 # running_mean
                1.0 + 0.1 * jnp.abs(jax.random.normal(k4, (d,), jnp.float32)))  # running_var

    keys = jax.random.split(key, 16)
    p = {}
    p['f_fc1'] = linear(keys[0], n_in, 100);  p['f_bn1'] = bn(keys[1], 100)
    p['f_fc2'] = linear(keys[2], 100, 80);    p['f_bn2'] = bn(keys[3], 80)
    p['f_fc3'] = linear(keys[4], 80, 60);     p['f_bn3'] = bn(keys[5], 60)
    p['c_fc1'] = linear(keys[6], 60, 40);     p['c_bn1'] = bn(keys[7], 40)
    p['c_fc2'] = linear(keys[8], 40, 20);     p['c_bn2'] = bn(keys[9], 20)
    p['c_fc3'] = linear(keys[10], 20, n_classes)
    p['d_fc1'] = linear(keys[11], 60, 40);    p['d_bn1'] = bn(keys[12], 40)
    p['d_fc2'] = linear(keys[13], 40, 2)
    return p


def _fold_bn(W, b, bn_params):
    gamma, beta, mean, var = bn_params
    s = gamma / jnp.sqrt(var + BN_EPS)
    return W * s[None, :], (b - mean) * s + beta


def _pack_weight(shape, placements):
    """Zero-padded bf16 weight with (W, row0, col0) blocks placed inside."""
    M = jnp.zeros(shape, jnp.float32)
    for W, r0, c0 in placements:
        M = M.at[r0:r0 + W.shape[0], c0:c0 + W.shape[1]].set(W)
    return M.astype(jnp.bfloat16)


def _pack_bias(width, placements):
    v = jnp.zeros((1, width), jnp.float32)
    for b, c0 in placements:
        v = v.at[0, c0:c0 + b.shape[0]].set(b)
    return v


def prepare_packed_params(raw, n_in, n_classes):
    out_w = _round_up(n_classes + 2, 8)          # narrow, lane-masked output slab

    w1, b1 = _fold_bn(*raw['f_fc1'], raw['f_bn1'])
    w2, b2 = _fold_bn(*raw['f_fc2'], raw['f_bn2'])
    w3, b3 = _fold_bn(*raw['f_fc3'], raw['f_bn3'])
    wc1, bc1 = _fold_bn(*raw['c_fc1'], raw['c_bn1'])
    wc2, bc2 = _fold_bn(*raw['c_fc2'], raw['c_bn2'])
    wc3, bc3 = raw['c_fc3']
    wd1, bd1 = _fold_bn(*raw['d_fc1'], raw['d_bn1'])
    wd2, bd2 = raw['d_fc2']

    # First layer keeps its true contraction width (no feature-axis padding of x).
    w1p = _pack_weight((n_in, LANE), [(w1, 0, 0)])
    # Middle layers consolidated into one (4,128,128) bf16 DMA.
    w_stack = jnp.stack([
        _pack_weight((LANE, LANE), [(w2, 0, 0)]),
        _pack_weight((LANE, LANE), [(w3, 0, 0)]),
        _pack_weight((LANE, LANE), [(wc1, 0, 0), (wd1, 0, 40)]),   # fused head entry
        _pack_weight((LANE, LANE), [(wc2, 0, 0)]),
    ])
    # All 128-wide biases consolidated into one (5,1,128) f32 DMA.
    b_stack = jnp.stack([
        _pack_bias(LANE, [(b1, 0)]),
        _pack_bias(LANE, [(b2, 0)]),
        _pack_bias(LANE, [(b3, 0)]),
        _pack_bias(LANE, [(bc1, 0), (bd1, 40)]),
        _pack_bias(LANE, [(bc2, 0)]),
    ])
    # Fused final weight: c_fc3 reads rows [0,20) -> cols [0,nc); d_fc2 reads
    # rows [40,80) -> cols [nc,nc+2). Rows [20,40) and [80,128) stay zero.
    w_final = _pack_weight((LANE, out_w), [(wc3, 0, 0), (wd2, 40, n_classes)])
    b_out = _pack_bias(out_w, [(bc3, 0), (bd2, n_classes)])

    packed = (w1p, w_stack, b_stack, w_final, b_out)
    return packed, out_w


# ------------------------------ wrapper --------------------------------------

def fcmodel_forward(x, packed, *, n_classes, out_w, tile_b=512):
    B, n_in = x.shape
    w1p, w_stack, b_stack, w_final, b_out = packed

    # >= 2 grid steps so the "parallel" batch axis can shard across both v7x
    # TensorCores; tile_b kept a multiple of 16 for bf16 sublane packing.
    n_steps = max(2, pl.cdiv(B, tile_b))
    tile_b = max(16, _round_up(pl.cdiv(B, n_steps), 16))
    b_pad = tile_b * n_steps

    xb = x.astype(jnp.bfloat16)
    if b_pad != B:
        xb = jnp.pad(xb, ((0, b_pad - B), (0, 0)))   # pad batch axis only

    const2 = lambda i: (0, 0)
    const3 = lambda i: (0, 0, 0)

    flops = 2 * b_pad * (n_in * LANE + 4 * LANE * LANE + LANE * out_w)
    bytes_accessed = (int(xb.size) * 2
                      + sum(int(p.size) * p.dtype.itemsize for p in packed)
                      + b_pad * out_w * 4)

    out = pl.pallas_call(
        fcmodel_kernel,
        out_shape=jax.ShapeDtypeStruct((b_pad, out_w), jnp.float32),
        grid=(n_steps,),
        in_specs=[
            pl.BlockSpec((tile_b, n_in), lambda i: (i, 0)),   # streamed x tile
            pl.BlockSpec(w1p.shape, const2),                  # params: VMEM-resident,
            pl.BlockSpec(w_stack.shape, const3),              # constant index_map,
            pl.BlockSpec(b_stack.shape, const3),              # DMA'd once each
            pl.BlockSpec(w_final.shape, const2),
            pl.BlockSpec(b_out.shape, const2),
        ],
        out_specs=pl.BlockSpec((tile_b, out_w), lambda i: (i, 0)),
        compiler_params=pltpu.CompilerParams(
            dimension_semantics=("parallel",),
            vmem_limit_bytes=32 * 1024 * 1024,     # safe on v5e/v6e/v7x
        ),
        cost_estimate=pl.CostEstimate(flops=flops, transcendentals=0,
                                      bytes_accessed=bytes_accessed),
    )(xb, w1p, w_stack, b_stack, w_final, b_out)

    class_out = out[:B, :n_classes]
    domain_out = out[:B, n_classes:n_classes + 2]
    return class_out, domain_out


# ----------------------------- references ------------------------------------

def reference_forward_f32(x, raw):
    """Original PyTorch eval-mode semantics in f32 (BN uses running stats)."""
    def lin(h, name):
        W, b = raw[name]
        return h @ W + b

    def bn(h, name):
        gamma, beta, mean, var = raw[name]
        return (h - mean) / jnp.sqrt(var + BN_EPS) * gamma + beta

    relu = lambda h: jnp.maximum(h, 0.0)
    h = relu(bn(lin(x, 'f_fc1'), 'f_bn1'))
    h = relu(bn(lin(h, 'f_fc2'), 'f_bn2'))
    feat = relu(bn(lin(h, 'f_fc3'), 'f_bn3'))
    c = relu(bn(lin(feat, 'c_fc1'), 'c_bn1'))
    c = relu(bn(lin(c, 'c_fc2'), 'c_bn2'))
    class_out = lin(c, 'c_fc3')
    d = relu(bn(lin(feat, 'd_fc1'), 'd_bn1'))
    domain_out = lin(d, 'd_fc2')
    return class_out, domain_out


def reference_forward_packed(x, packed, n_classes):
    """Same math as the kernel (folded BN, fused heads, bf16 matmuls) in plain XLA."""
    w1p, w_stack, b_stack, w_final, b_out = packed

    def drl(h, w, b):
        y = jnp.dot(h, w, preferred_element_type=jnp.float32) + b
        return jnp.maximum(y, 0.0).astype(jnp.bfloat16)

    h = x.astype(jnp.bfloat16)
    h = drl(h, w1p, b_stack[0])
    h = drl(h, w_stack[0], b_stack[1])
    feat = drl(h, w_stack[1], b_stack[2])
    head = drl(feat, w_stack[2], b_stack[3])
    hc2 = drl(head, w_stack[3], b_stack[4])
    lane = jnp.arange(LANE)[None, :]
    merged = jnp.where(lane < 40, hc2, head)
    out = jnp.dot(merged, w_final, preferred_element_type=jnp.float32) + b_out
    return out[:, :n_classes], out[:, n_classes:n_classes + 2]


# -------------------------------- main ---------------------------------------

if __name__ == "__main__":
    B = 8
    N_IN = 32
    N_CLASSES = 4

    key = jax.random.PRNGKey(0)
    kx, kp = jax.random.split(key)
    x = jax.random.normal(kx, (B, N_IN), jnp.float32)

    raw = init_raw_params(kp, N_IN, N_CLASSES)
    packed, out_w = prepare_packed_params(raw, N_IN, N_CLASSES)

    class_out, domain_out = fcmodel_forward(
        x, packed, n_classes=N_CLASSES, out_w=out_w, tile_b=512)
    jax.block_until_ready((class_out, domain_out))

    assert class_out.shape == (B, N_CLASSES) and domain_out.shape == (B, 2)

    # (1) Kernel-logic check vs identical folded/fused/bf16 math in plain XLA (tight).
    cq, dq = reference_forward_packed(x, packed, N_CLASSES)
    assert jnp.allclose(class_out, cq, rtol=1e-2, atol=1e-2)
    assert jnp.allclose(domain_out, dq, rtol=1e-2, atol=1e-2)

    # (2) Semantic check vs original f32 eval-mode model (bf16-level tolerance).
    #     NOTE: bf16 matmuls + folded BN diverge slightly from pure-f32 logits.
    cr, dr_ = reference_forward_f32(x, raw)
    assert jnp.allclose(class_out, cr, rtol=5e-2, atol=5e-2)
    assert jnp.allclose(domain_out, dr_, rtol=5e-2, atol=5e-2)

    print("KERNEL_OK")
</pallas_src>

<mosaic_0001>
module attributes {stable_mosaic.version = 11 : i64} {
  func.func @fcmodel_kernel(%arg0: i32, %arg1: memref<16x32xbf16, #tpu.memory_space<vmem>>, %arg2: memref<32x128xbf16, #tpu.memory_space<vmem>>, %arg3: memref<4x128x128xbf16, #tpu.memory_space<vmem>>, %arg4: memref<5x1x128xf32, #tpu.memory_space<vmem>>, %arg5: memref<128x8xbf16, #tpu.memory_space<vmem>>, %arg6: memref<1x8xf32, #tpu.memory_space<vmem>>, %arg7: memref<16x8xf32, #tpu.memory_space<vmem>>) attributes {dimension_semantics = [#tpu.dimension_semantics<parallel>], iteration_bounds = array<i64: 2>, scalar_prefetch = 0 : i64, scratch_operands = 0 : i64, tpu.core_type = #tpu.core_type<tc>, window_params = [{transform_indices = @transform_0, window_bounds = array<i64: 16, 32>}, {pipeline_mode = #tpu.pipeline_mode<synchronous>, transform_indices = @transform_1, window_bounds = array<i64: 32, 128>}, {pipeline_mode = #tpu.pipeline_mode<synchronous>, transform_indices = @transform_2, window_bounds = array<i64: 4, 128, 128>}, {pipeline_mode = #tpu.pipeline_mode<synchronous>, transform_indices = @transform_3, window_bounds = array<i64: 5, 1, 128>}, {pipeline_mode = #tpu.pipeline_mode<synchronous>, transform_indices = @transform_4, window_bounds = array<i64: 128, 8>}, {pipeline_mode = #tpu.pipeline_mode<synchronous>, transform_indices = @transform_5, window_bounds = array<i64: 1, 8>}, {transform_indices = @transform_6, window_bounds = array<i64: 16, 8>}]} {
    %c0 = arith.constant 0 : index
    %c0_0 = arith.constant 0 : index
    %0 = vector.load %arg1[%c0, %c0_0] : memref<16x32xbf16, #tpu.memory_space<vmem>>, vector<16x32xbf16>
    %c0_1 = arith.constant 0 : index
    %c0_2 = arith.constant 0 : index
    %1 = vector.load %arg2[%c0_1, %c0_2] : memref<32x128xbf16, #tpu.memory_space<vmem>>, vector<32x128xbf16>
    %c0_3 = arith.constant 0 : index
    %c0_4 = arith.constant 0 : index
    %c0_5 = arith.constant 0 : index
    %2 = vector.load %arg4[%c0_3, %c0_4, %c0_5] : memref<5x1x128xf32, #tpu.memory_space<vmem>>, vector<1x1x128xf32>
    %3 = vector.shape_cast %2 : vector<1x1x128xf32> to vector<1x128xf32>
    %cst = arith.constant dense<0.000000e+00> : vector<16x128xf32>
    %4 = tpu.matmul %0, %1, %cst {dimension_numbers = #tpu.dot_dimension_numbers<[1], [0], [0], [1], [0, 0, 1, 1], [], []>} : vector<16x32xbf16>, vector<32x128xbf16>, vector<16x128xf32> -> vector<16x128xf32>
    %5 = vector.broadcast %3 : vector<1x128xf32> to vector<16x128xf32>
    %6 = arith.addf %4, %5 : vector<16x128xf32>
    %cst_6 = arith.constant 0.000000e+00 : f32
    %7 = vector.broadcast %cst_6 : f32 to vector<16x128xf32>
    %8 = arith.maximumf %6, %7 : vector<16x128xf32>
    %9 = arith.truncf %8 : vector<16x128xf32> to vector<16x128xbf16>
    %c0_7 = arith.constant 0 : index
    %c0_8 = arith.constant 0 : index
    %c0_9 = arith.constant 0 : index
    %10 = vector.load %arg3[%c0_7, %c0_8, %c0_9] : memref<4x128x128xbf16, #tpu.memory_space<vmem>>, vector<1x128x128xbf16>
    %11 = vector.shape_cast %10 : vector<1x128x128xbf16> to vector<128x128xbf16>
    %c1 = arith.constant 1 : index
    %c0_10 = arith.constant 0 : index
    %c0_11 = arith.constant 0 : index
    %12 = vector.load %arg4[%c1, %c0_10, %c0_11] : memref<5x1x128xf32, #tpu.memory_space<vmem>>, vector<1x1x128xf32>
    %13 = vector.shape_cast %12 : vector<1x1x128xf32> to vector<1x128xf32>
    %cst_12 = arith.constant dense<0.000000e+00> : vector<16x128xf32>
    %14 = tpu.matmul %9, %11, %cst_12 {dimension_numbers = #tpu.dot_dimension_numbers<[1], [0], [0], [1], [0, 0, 1, 1], [], []>} : vector<16x128xbf16>, vector<128x128xbf16>, vector<16x128xf32> -> vector<16x128xf32>
    %15 = vector.broadcast %13 : vector<1x128xf32> to vector<16x128xf32>
    %16 = arith.addf %14, %15 : vector<16x128xf32>
    %cst_13 = arith.constant 0.000000e+00 : f32
    %17 = vector.broadcast %cst_13 : f32 to vector<16x128xf32>
    %18 = arith.maximumf %16, %17 : vector<16x128xf32>
    %19 = arith.truncf %18 : vector<16x128xf32> to vector<16x128xbf16>
    %c1_14 = arith.constant 1 : index
    %c0_15 = arith.constant 0 : index
    %c0_16 = arith.constant 0 : index
    %20 = vector.load %arg3[%c1_14, %c0_15, %c0_16] : memref<4x128x128xbf16, #tpu.memory_space<vmem>>, vector<1x128x128xbf16>
    %21 = vector.shape_cast %20 : vector<1x128x128xbf16> to vector<128x128xbf16>
    %c2 = arith.constant 2 : index
    %c0_17 = arith.constant 0 : index
    %c0_18 = arith.constant 0 : index
    %22 = vector.load %arg4[%c2, %c0_17, %c0_18] : memref<5x1x128xf32, #tpu.memory_space<vmem>>, vector<1x1x128xf32>
    %23 = vector.shape_cast %22 : vector<1x1x128xf32> to vector<1x128xf32>
    %cst_19 = arith.constant dense<0.000000e+00> : vector<16x128xf32>
    %24 = tpu.matmul %19, %21, %cst_19 {dimension_numbers = #tpu.dot_dimension_numbers<[1], [0], [0], [1], [0, 0, 1, 1], [], []>} : vector<16x128xbf16>, vector<128x128xbf16>, vector<16x128xf32> -> vector<16x128xf32>
    %25 = vector.broadcast %23 : vector<1x128xf32> to vector<16x128xf32>
    %26 = arith.addf %24, %25 : vector<16x128xf32>
    %cst_20 = arith.constant 0.000000e+00 : f32
    %27 = vector.broadcast %cst_20 : f32 to vector<16x128xf32>
    %28 = arith.maximumf %26, %27 : vector<16x128xf32>
    %29 = arith.truncf %28 : vector<16x128xf32> to vector<16x128xbf16>
    %c2_21 = arith.constant 2 : index
    %c0_22 = arith.constant 0 : index
    %c0_23 = arith.constant 0 : index
    %30 = vector.load %arg3[%c2_21, %c0_22, %c0_23] : memref<4x128x128xbf16, #tpu.memory_space<vmem>>, vector<1x128x128xbf16>
    %31 = vector.shape_cast %30 : vector<1x128x128xbf16> to vector<128x128xbf16>
    %c3 = arith.constant 3 : index
    %c0_24 = arith.constant 0 : index
    %c0_25 = arith.constant 0 : index
    %32 = vector.load %arg4[%c3, %c0_24, %c0_25] : memref<5x1x128xf32, #tpu.memory_space<vmem>>, vector<1x1x128xf32>
    %33 = vector.shape_cast %32 : vector<1x1x128xf32> to vector<1x128xf32>
    %cst_26 = arith.constant dense<0.000000e+00> : vector<16x128xf32>
    %34 = tpu.matmul %29, %31, %cst_26 {dimension_numbers = #tpu.dot_dimension_numbers<[1], [0], [0], [1], [0, 0, 1, 1], [], []>} : vector<16x128xbf16>, vector<128x128xbf16>, vector<16x128xf32> -> vector<16x128xf32>
    %35 = vector.broadcast %33 : vector<1x128xf32> to vector<16x128xf32>
    %36 = arith.addf %34, %35 : vector<16x128xf32>
    %cst_27 = arith.constant 0.000000e+00 : f32
    %37 = vector.broadcast %cst_27 : f32 to vector<16x128xf32>
    %38 = arith.maximumf %36, %37 : vector<16x128xf32>
    %39 = arith.truncf %38 : vector<16x128xf32> to vector<16x128xbf16>
    %c3_28 = arith.constant 3 : index
    %c0_29 = arith.constant 0 : index
    %c0_30 = arith.constant 0 : index
    %40 = vector.load %arg3[%c3_28, %c0_29, %c0_30] : memref<4x128x128xbf16, #tpu.memory_space<vmem>>, vector<1x128x128xbf16>
    %41 = vector.shape_cast %40 : vector<1x128x128xbf16> to vector<128x128xbf16>
    %c4 = arith.constant 4 : index
    %c0_31 = arith.constant 0 : index
    %c0_32 = arith.constant 0 : index
    %42 = vector.load %arg4[%c4, %c0_31, %c0_32] : memref<5x1x128xf32, #tpu.memory_space<vmem>>, vector<1x1x128xf32>
    %43 = vector.shape_cast %42 : vector<1x1x128xf32> to vector<1x128xf32>
    %cst_33 = arith.constant dense<0.000000e+00> : vector<16x128xf32>
    %44 = tpu.matmul %39, %41, %cst_33 {dimension_numbers = #tpu.dot_dimension_numbers<[1], [0], [0], [1], [0, 0, 1, 1], [], []>} : vector<16x128xbf16>, vector<128x128xbf16>, vector<16x128xf32> -> vector<16x128xf32>
    %45 = vector.broadcast %43 : vector<1x128xf32> to vector<16x128xf32>
    %46 = arith.addf %44, %45 : vector<16x128xf32>
    %cst_34 = arith.constant 0.000000e+00 : f32
    %47 = vector.broadcast %cst_34 : f32 to vector<16x128xf32>
    %48 = arith.maximumf %46, %47 : vector<16x128xf32>
    %49 = arith.truncf %48 : vector<16x128xf32> to vector<16x128xbf16>
    %50 = tpu.iota {dimensions = array<i32: 1>} : vector<16x128xi32>
    %c40_i32 = arith.constant 40 : i32
    %51 = vector.broadcast %c40_i32 : i32 to vector<16x128xi32>
    %52 = arith.cmpi slt, %50, %51 : vector<16x128xi32>
    %53 = arith.select %52, %49, %39 : vector<16x128xi1>, vector<16x128xbf16>
    %c0_35 = arith.constant 0 : index
    %c0_36 = arith.constant 0 : index
    %54 = vector.load %arg5[%c0_35, %c0_36] : memref<128x8xbf16, #tpu.memory_space<vmem>>, vector<128x8xbf16>
    %cst_37 = arith.constant dense<0.000000e+00> : vector<16x8xf32>
    %55 = tpu.matmul %53, %54, %cst_37 {dimension_numbers = #tpu.dot_dimension_numbers<[1], [0], [0], [1], [0, 0, 1, 1], [], []>} : vector<16x128xbf16>, vector<128x8xbf16>, vector<16x8xf32> -> vector<16x8xf32>
    %c0_38 = arith.constant 0 : index
    %c0_39 = arith.constant 0 : index
    %56 = vector.load %arg6[%c0_38, %c0_39] : memref<1x8xf32, #tpu.memory_space<vmem>>, vector<1x8xf32>
    %57 = vector.broadcast %56 : vector<1x8xf32> to vector<16x8xf32>
    %58 = arith.addf %55, %57 : vector<16x8xf32>
    %c0_40 = arith.constant 0 : index
    %c0_41 = arith.constant 0 : index
    %59 = vector.load %arg7[%c0_40, %c0_41] : memref<16x8xf32, #tpu.memory_space<vmem>>, vector<16x8xf32>
    tpu.vector_store %arg7[%c0_40, %c0_41], %58 {strides = array<i32>} : memref<16x8xf32, #tpu.memory_space<vmem>>, vector<16x8xf32>,
    return
  }
  func.func @transform_0(%arg0: i32) -> (i32, i32) {
    %c0_i32 = arith.constant 0 : i32
    %c0_i32_0 = arith.constant 0 : i32
    return %arg0, %c0_i32 : i32, i32
  }
  func.func @transform_1(%arg0: i32) -> (i32, i32) {
    %c0_i32 = arith.constant 0 : i32
    %c0_i32_0 = arith.constant 0 : i32
    %c0_i32_1 = arith.constant 0 : i32
    return %c0_i32, %c0_i32_0 : i32, i32
  }
  func.func @transform_2(%arg0: i32) -> (i32, i32, i32) {
    %c0_i32 = arith.constant 0 : i32
    %c0_i32_0 = arith.constant 0 : i32
    %c0_i32_1 = arith.constant 0 : i32
    %c0_i32_2 = arith.constant 0 : i32
    return %c0_i32, %c0_i32_0, %c0_i32_1 : i32, i32, i32
  }
  func.func @transform_3(%arg0: i32) -> (i32, i32, i32) {
    %c0_i32 = arith.constant 0 : i32
    %c0_i32_0 = arith.constant 0 : i32
    %c0_i32_1 = arith.constant 0 : i32
    %c0_i32_2 = arith.constant 0 : i32
    return %c0_i32, %c0_i32_0, %c0_i32_1 : i32, i32, i32
  }
  func.func @transform_4(%arg0: i32) -> (i32, i32) {
    %c0_i32 = arith.constant 0 : i32
    %c0_i32_0 = arith.constant 0 : i32
    %c0_i32_1 = arith.constant 0 : i32
    return %c0_i32, %c0_i32_0 : i32, i32
  }
  func.func @transform_5(%arg0: i32) -> (i32, i32) {
    %c0_i32 = arith.constant 0 : i32
    %c0_i32_0 = arith.constant 0 : i32
    %c0_i32_1 = arith.constant 0 : i32
    return %c0_i32, %c0_i32_0 : i32, i32
  }
  func.func @transform_6(%arg0: i32) -> (i32, i32) {
    %c0_i32 = arith.constant 0 : i32
    %c0_i32_0 = arith.constant 0 : i32
    return %arg0, %c0_i32 : i32, i32
  }
}

</mosaic_0001>

<bundles_post_ra>
// kernel: tpu_custom_call.1
= control target key start
LH: loop header
LB: loop body
LE: loop exit
PB: predicated region body
PF: predicated region fallthrough
CT: control target
= control target key end

     0   :  { %11 = vsyncpa [#allocation3], 0  ;;  %s1381_s21 = smov 0   ;;  %s1525_s0 = inlined_call_operand.vmem [shape: bf16[32,32], index: 0, kind: input, shape index: {}]   ;;  %s1526_s1 = inlined_call_operand.vmem [shape: bf16[32,128], index: 1, kind: input, shape index: {}]   ;;  %s1527_s2 = inlined_call_operand.hbm [shape: bf16[4,128,128], index: 2, kind: input, shape index: {}]   ;;  %s1528_s3 = inlined_call_operand.vmem [shape: f32[5,1,128], index: 3, kind: input, shape index: {}]   ;;  %s1529_s4 = inlined_call_operand.vmem [shape: bf16[128,8], index: 4, kind: input, shape index: {}]   ;;  %s1530_s5 = inlined_call_operand.vmem [shape: f32[1,8], index: 5, kind: input, shape index: {}]   ;;  %s1531_s6 = inlined_call_operand.vmem [shape: f32[32,8], index: 6, kind: output, shape index: {}]  }
   0x1 LB: > { %s1012_s22 = sadd.s32 4294967295, %s1338_s21   ;;  %p1014_p0 = scmp.ge.s32.totalorder %s1338_s21, 1  ;;  %s1338_s21 = sphi %s1381_s21, %s17_s21  }
   0x2   : > { %p179_p1 = scmp.lt.s32.totalorder %s1338_s21, 3  ;;  %s1340_s23 = smov [#allocation2]  }
   0x3   : > { %s194_s24 = sshll.u32 %s1340_s23, 4  ;;  %p1393_p3 = scmp.eq.s32.totalorder %s1012_s22, 0  ;;  %s195_s24 = int_to_ptr.vmem [resolvable:$true] %s194_s24 }
   0x4   : > { %p1389_p2 = pnand %p1014_p0, %p179_p1  ;;  %s1313_s27 = scalar_lea.vmem %s195_s24, 4096 }
   0x5   : > { %p1314_p7 = scmp.ne.s32.totalorder %s195_s24, %s1313_s27  ;;  %p1321_p10 = scmp.lt.s32.totalorder %s195_s24, %s195_s24 }
   0x6   : > { %p1239_p4 = pneg %p1389_p2  ;;  %p1322_p11 = scmp.lt.s32.totalorder %s1313_s27, %s1313_s27 }
   0x8   : > { %p1240_p5 = pnand %p1393_p3, %p1239_p4  ;;  %p1323_p12 = por %p1322_p11, %p1321_p10 }
   0xa   : > { %p1304_p6 = pneg %p1240_p5 }
   0xc   : > { %p1316_p8 = pnand %p1314_p7, %p1304_p6 }
   0xe   : > { %p1317_p9 = pneg %p1316_p8 }
  0x10   : > { %p1324_p13 = pnand %p1323_p12, %p1317_p9 }
  0x12   : > { %1327 = shalt.err (!%p1324_p13)
}
  0x13   : > { %s1341_s28 = smov 64   ;;  %s1342_s29 = smov 4  }
  0x14   : > { %1242 = dma.hbm_to_vmem [thread:$0]  (!%p1240_p5), %s1527_s2, 4096, %s195_s24, [#allocation3], %s1341_s28, %s1341_s28, %s1342_s29  }
  0x15   : > { %228 = sbr.rel (%p1389_p2) target bundleno = 1253 (0x4e5), region = 44 }
  0x1a   : > { %1333 = dma.done.wait (%p1393_p3), [#allocation3], 4096  }
  0x1b   : > { %1335 = vsyncadd (%p1393_p3), [#allocation3], 4294963200  ;;  %s1019_s8 = sshll.u32 %s1012_s22, 1  ;;  %v1343_v0 = vmov 0.0   ;;  %vm1344_vm0 = vmmov 0   ;;  %v1259_v1 = vld [vmem:[%s1526_s1 + $0x8] sm:$0xff]  }
  0x1c   : > { %1127 = vmatprep.subr.bf16.mxu0 %v1343_v0  ;;  %1131 = vmatprep.mubr.msk.bf16.mxu0 %vm1344_vm0, %v1343_v0  ;;  %p259_p0 = scmp.lt.s32.totalorder %s1019_s8, 3  ;;  %v1260_v2 = vld [vmem:[%s1526_s1] sm:$0xff]   ;;  %v1262_v3 = vld [vmem:[#allocation2 + $0x38] sm:$0xff]   ;;  %v1263_v5 = vld [vmem:[#allocation2 + $0x30] sm:$0xff]   ;;  %vm303_vm1 = vcmask 261120   ;;  %vm941_vm5 = vcmask 64512  }
  0x1d   : > { %1135 = vmatprep.subr.bf16.mxu1 %v1343_v0  ;;  %1151 = vmatprep.mubr.msk.bf16.mxu1 %vm1344_vm0, %v1343_v0  ;;  %v1264_v6 = vld [vmem:[#allocation2 + $0x28] sm:$0xff]   ;;  %v1265_v7 = vld [vmem:[#allocation2 + $0x20] sm:$0xff]   ;;  %v1266_v8 = vld [vmem:[#allocation2 + $0x18] sm:$0xff]  }
  0x1e   : > { %s1535_s8 = smov (!%p259_p0, %s1019_s8), 3  ;;  %1128 = vmatpush3.bf16.msra.mxu0 %v1259_v1  ;;  %1136 = vmatpush3.bf16.msra.mxu1 %v1262_v3  ;;  %v1267_v9 = vld [vmem:[#allocation2 + $0x10] sm:$0xff]   ;;  %v1268_v10 = vld [vmem:[#allocation2 + $0x8] sm:$0xff]   ;;  %v1269_v11 = vld [vmem:[#allocation2] sm:$0xff]  }
  0x1f   : > { %s1020_s9 = sshll.u32 %s1535_s8, 2  ;;  %1129 = vmatprep.subr.bf16.mxu0 %v1343_v0  ;;  %1137 = vmatprep.subr.bf16.mxu1 %v1343_v0  ;;  %v1270_v12 = vld [vmem:[#allocation2 + $0x78] sm:$0xff]   ;;  %v1271_v13 = vld [vmem:[#allocation2 + $0x70] sm:$0xff]   ;;  %v1272_v14 = vld [vmem:[#allocation2 + $0x68] sm:$0xff]   ;;  %s1022_s22 = sshll.u32 %s1535_s8, 3 }
  0x20   : > { %s262_s14 = scalar_lea.vmem %s1525_s0, %s1020_s9  ;;  %v1273_v15 = vld [vmem:[#allocation2 + $0x60] sm:$0xff]   ;;  %v1274_v16 = vld [vmem:[#allocation2 + $0x58] sm:$0xff]   ;;  %v1275_v27 = vld [vmem:[#allocation2 + $0x50] sm:$0xff]   ;;  %s268_s27 = scalar_lea.vmem %s1531_s6, %s1022_s22 }
  0x21   : > { %v1261_v4 = vld [vmem:[%s262_s14] sm:$0xff]   ;;  %v1276_v28 = vld [vmem:[#allocation2 + $0x48] sm:$0xff]   ;;  %v1278_v30 = vld [vmem:[#allocation2 + $0xb8] sm:$0xff]  }
  0x22   : > { %1130 = vmatpush3.bf16.msra.mxu0 %v1260_v2  ;;  %1138 = vmatpush3.bf16.msra.mxu1 %v1263_v5  ;;  %v1023_v17 = vld [vmem:[%s1528_s3] ss:$0 sm:$0xff]  ;;  %v1279_v31 = vld [vmem:[#allocation2 + $0xb0] sm:$0xff]   ;;  %v1280_v32 = vld [vmem:[#allocation2 + $0xa8] sm:$0xff]  }
  0x23   : > { %1155 = vmatprep.subr.bf16.mxu0 %v1343_v0  ;;  %1139 = vmatprep.subr.bf16.mxu1 %v1343_v0  ;;  %v1277_v29 = vld [vmem:[#allocation2 + $0x40] sm:$0xff]   ;;  %v1282_v34 = vld [vmem:[#allocation2 + $0x98] sm:$0xff]   ;;  %v1283_v45 = vld [vmem:[#allocation2 + $0x90] sm:$0xff]  }
  0x24   : > { %v1281_v33 = vld [vmem:[#allocation2 + $0xa0] sm:$0xff]   ;;  %v1284_v46 = vld [vmem:[#allocation2 + $0x88] sm:$0xff]   ;;  %v1286_v48 = vld [vmem:[#allocation2 + $0xf8] sm:$0xff]  }
  0x25   : > { %1132 = vmatmul.mubr.msk.bf16.vlgmr.msra.gmra.mxu0 %vm303_vm1, %v1261_v4  ;;  %v1029_v35 = vld [vmem:[%s1528_s3 + $0x1] ss:$0 sm:$0xff]  ;;  %v1287_v49 = vld [vmem:[#allocation2 + $0xf0] sm:$0xff]   ;;  %v1288_v50 = vld [vmem:[#allocation2 + $0xe8] sm:$0xff]  }
  0x26   : > { %1171 = vmatprep.mubr.msk.bf16.mxu0 %vm1344_vm0, %v1343_v0  ;;  %1140 = vmatpush3.bf16.msra.mxu1 %v1264_v6  ;;  %v1285_v47 = vld [vmem:[#allocation2 + $0x80] sm:$0xff]   ;;  %v1290_v52 = vld [vmem:[#allocation2 + $0xd8] sm:$0xff]   ;;  %v1291_v63 = vld [vmem:[#allocation2 + $0xd0] sm:$0xff]  }
  0x27   : > { %1141 = vmatprep.subr.bf16.mxu1 %v1343_v0  ;;  %1156 = vmatpush3.bf16.msra.mxu0 %v1270_v12  ;;  %v1289_v51 = vld [vmem:[#allocation2 + $0xe0] sm:$0xff]   ;;  %v1292_v1 = vld [vmem:[#allocation2 + $0xc8] sm:$0xff]   ;;  %v1294_v3 = vld [vmem:[%s1529_s4 + $0x38] sm:$0xff]  }
  0x28   : > { %1157 = vmatprep.subr.bf16.mxu0 %v1343_v0  ;;  %v1039_v53 = vld [vmem:[%s1528_s3 + $0x2] ss:$0 sm:$0xff]  ;;  %v1295_v4 = vld [vmem:[%s1529_s4 + $0x30] sm:$0xff]   ;;  %v1296_v5 = vld [vmem:[%s1529_s4 + $0x28] sm:$0xff]  }
  0x29   : > { %v1293_v2 = vld [vmem:[#allocation2 + $0xc0] sm:$0xff]  }
  0x2a   : > { %1142 = vmatpush3.bf16.msra.mxu1 %v1265_v7  ;;  %v1297_v6 = vld [vmem:[%s1529_s4 + $0x20] sm:$0xff]   ;;  %v1298_v7 = vld [vmem:[%s1529_s4 + $0x18] sm:$0xff]  }
  0x2b   : > { %1143 = vmatprep.subr.bf16.mxu1 %v1343_v0  ;;  %1158 = vmatpush3.bf16.msra.mxu0 %v1271_v13 }
  0x2c   : > { %1159 = vmatprep.subr.bf16.mxu0 %v1343_v0 }
  0x2e   : > { %1144 = vmatpush3.bf16.msra.mxu1 %v1266_v8  ;;  %v1049_v8 = vld [vmem:[%s1528_s3 + $0x3] ss:$0 sm:$0xff] }
  0x2f   : > { %1145 = vmatprep.subr.bf16.mxu1 %v1343_v0  ;;  %1160 = vmatpush3.bf16.msra.mxu0 %v1272_v14 }
  0x30   : > { %1161 = vmatprep.subr.bf16.mxu0 %v1343_v0 }
  0x32   : > { %1146 = vmatpush3.bf16.msra.mxu1 %v1267_v9 }
  0x33   : > { %1147 = vmatprep.subr.bf16.mxu1 %v1343_v0  ;;  %1162 = vmatpush3.bf16.msra.mxu0 %v1273_v15 }
  0x34   : > { %1163 = vmatprep.subr.bf16.mxu0 %v1343_v0 }
  0x36   : > { %1148 = vmatpush3.bf16.msra.mxu1 %v1268_v10 }
  0x37   : > { %1149 = vmatprep.subr.bf16.mxu1 %v1343_v0  ;;  %1164 = vmatpush3.bf16.msra.mxu0 %v1274_v16 }
  0x38   : > { %1165 = vmatprep.subr.bf16.mxu0 %v1343_v0 }
  0x3a   : > { %1150 = vmatpush3.bf16.msra.mxu1 %v1269_v11 }
  0x3b   : > { %1175 = vmatprep.subr.bf16.mxu1 %v1343_v0  ;;  %1166 = vmatpush3.bf16.msra.mxu0 %v1275_v27  ;;  %v1345_v27 = vmov 0  }
  0x3c   : > { %1167 = vmatprep.subr.bf16.mxu0 %v1343_v0 }
  0x3f   : > { %1168 = vmatpush3.bf16.msra.mxu0 %v1276_v28 }
  0x40   : > { %1169 = vmatprep.subr.bf16.mxu0 %v1343_v0 }
  0x43   : > { %1170 = vmatpush3.bf16.msra.mxu0 %v1277_v29 }
  0x44   : > { %1195 = vmatprep.subr.bf16.mxu0 %v1343_v0 }
  0xe5   : > { %v341_v18 = vpop.f32.mrf.mxu0 }
  0xe6   : > { %v342_v20 = vadd.f32 %v1023_v17, %v341_v18  ;;  %v1299_v18 = vld [vmem:[%s1529_s4 + $0x10] sm:$0xff]  }
  0xe7   : > { %v1133_v19 = vpop.f32.mrf.mxu0 }
  0xe8   : > { %v348_v24 = vmax.f32 %v342_v20, 0.0  ;;  %v1300_v19 = vld [vmem:[%s1529_s4 + $0x8] sm:$0xff]   ;;  %v1301_v20 = vld [vmem:[%s1529_s4] sm:$0xff]  }
  0xe9   : > { %v344_v21 = vpop.f32.mrf.mxu0 }
  0xea   : > { %v345_v22 = vadd.f32 %v1023_v17, %v344_v21  ;;  %v818_v21 = vlaneseq }
  0xeb   : > { %v1134_v23 = vpop.f32.mrf.mxu0 }
  0xec   : > { %v349_v25 = vmax.f32 %v345_v22, 0.0  ;;  %v819_v22 = vand.u32 127, %v818_v21  ;;  %v824_v23 = vshrl.u32 %v818_v21, 7 }
  0xee   : > { %v350_v26 = vpack.c.bf16 %v349_v25, %v348_v24  ;;  %vm820_vm2 = vcmp.lt.s32.totalorder %v819_v22, 40  ;;  %v1059_v24 = vld [vmem:[%s1528_s3 + $0x4] ss:$0 sm:$0xff] }
  0xef   : > { %vm821_vm3 = vmpackc.low %vm820_vm2, %vm820_vm2 }
  0xf0   : > { %1152 = vmatmul.mubr.bf16.vlgmr.msra.gmra.mxu1 %v350_v26  ;;  %v825_v26 = vsub.s32 0, %v824_v23  ;;  %v822_v28 = vsel %vm821_vm3, 65537, %v1345_v27 }
  0xf1   : > { %1191 = vmatprep.mubr.msk.bf16.mxu1 %vm1344_vm0, %v1343_v0  ;;  %1176 = vmatpush3.bf16.msra.mxu1 %v1278_v30 }
  0xf2   : > { %1177 = vmatprep.subr.bf16.mxu1 %v1343_v0 }
  0xf5   : > { %1178 = vmatpush3.bf16.msra.mxu1 %v1279_v31  ;;  %v826_v31 = vrot.slane %v822_v28, %v825_v26 }
  0xf6   : > { %1179 = vmatprep.subr.bf16.mxu1 %v1343_v0 }
  0xf7   : > { %vm827_vm4 = vcmp.ne.s16.totalorder %v826_v31, 0 }
  0xf9   : > { %1180 = vmatpush3.bf16.msra.mxu1 %v1280_v32 }
  0xfa   : > { %1181 = vmatprep.subr.bf16.mxu1 %v1343_v0 }
  0xfd   : > { %1182 = vmatpush3.bf16.msra.mxu1 %v1281_v33 }
  0xfe   : > { %1183 = vmatprep.subr.bf16.mxu1 %v1343_v0 }
 0x101   : > { %1184 = vmatpush3.bf16.msra.mxu1 %v1282_v34 }
 0x102   : > { %1185 = vmatprep.subr.bf16.mxu1 %v1343_v0 }
 0x105   : > { %1186 = vmatpush3.bf16.msra.mxu1 %v1283_v45 }
 0x106   : > { %1187 = vmatprep.subr.bf16.mxu1 %v1343_v0 }
 0x109   : > { %1188 = vmatpush3.bf16.msra.mxu1 %v1284_v46 }
 0x10a   : > { %1189 = vmatprep.subr.bf16.mxu1 %v1343_v0 }
 0x10d   : > { %1190 = vmatpush3.bf16.msra.mxu1 %v1285_v47 }
 0x10e   : > { %1215 = vmatprep.subr.bf16.mxu1 %v1343_v0 }
 0x1b0   : > { %v457_v36 = vpop.f32.mrf.mxu1 }
 0x1b1   : > { %v458_v38 = vadd.f32 %v1029_v35, %v457_v36 }
 0x1b2   : > { %v1153_v37 = vpop.f32.mrf.mxu1 }
 0x1b3   : > { %v464_v42 = vmax.f32 %v458_v38, 0.0  ;;  %v1068_v38 = vld [vmem:[%s1530_s5] ss:$0 sm:$0xff] }
 0x1b4   : > { %v460_v39 = vpop.f32.mrf.mxu1 }
 0x1b5   : > { %v461_v40 = vadd.f32 %v1029_v35, %v460_v39 }
 0x1b6   : > { %v1154_v41 = vpop.f32.mrf.mxu1 }
 0x1b7   : > { %v465_v43 = vmax.f32 %v461_v40, 0.0 }
 0x1b9   : > { %v466_v44 = vpack.c.bf16 %v465_v43, %v464_v42 }
 0x1bb   : > { %1172 = vmatmul.mubr.bf16.vlgmr.msra.gmra.mxu0 %v466_v44 }
 0x1bc   : > { %1211 = vmatprep.mubr.msk.bf16.mxu0 %vm1344_vm0, %v1343_v0  ;;  %1196 = vmatpush3.bf16.msra.mxu0 %v1286_v48 }
 0x1bd   : > { %1197 = vmatprep.subr.bf16.mxu0 %v1343_v0 }
 0x1c0   : > { %1198 = vmatpush3.bf16.msra.mxu0 %v1287_v49 }
 0x1c1   : > { %1199 = vmatprep.subr.bf16.mxu0 %v1343_v0 }
 0x1c4   : > { %1200 = vmatpush3.bf16.msra.mxu0 %v1288_v50 }
 0x1c5   : > { %1201 = vmatprep.subr.bf16.mxu0 %v1343_v0 }
 0x1c8   : > { %1202 = vmatpush3.bf16.msra.mxu0 %v1289_v51 }
 0x1c9   : > { %1203 = vmatprep.subr.bf16.mxu0 %v1343_v0 }
 0x1cc   : > { %1204 = vmatpush3.bf16.msra.mxu0 %v1290_v52 }
 0x1cd   : > { %1205 = vmatprep.subr.bf16.mxu0 %v1343_v0 }
 0x1d0   : > { %1206 = vmatpush3.bf16.msra.mxu0 %v1291_v63 }
 0x1d1   : > { %1207 = vmatprep.subr.bf16.mxu0 %v1343_v0 }
 0x1d4   : > { %1208 = vmatpush3.bf16.msra.mxu0 %v1292_v1 }
 0x1d5   : > { %1209 = vmatprep.subr.bf16.mxu0 %v1343_v0 }
 0x1d8   : > { %1210 = vmatpush3.bf16.msra.mxu0 %v1293_v2 }
 0x27b   : > { %v574_v54 = vpop.f32.mrf.mxu0 }
 0x27c   : > { %v575_v56 = vadd.f32 %v1039_v53, %v574_v54 }
 0x27d   : > { %v1173_v55 = vpop.f32.mrf.mxu0 }
 0x27e   : > { %v581_v60 = vmax.f32 %v575_v56, 0.0 }
 0x27f   : > { %v577_v57 = vpop.f32.mrf.mxu0 }
 0x280   : > { %v578_v58 = vadd.f32 %v1039_v53, %v577_v57 }
 0x281   : > { %v1174_v59 = vpop.f32.mrf.mxu0 }
 0x282   : > { %v582_v61 = vmax.f32 %v578_v58, 0.0 }
 0x284   : > { %v583_v62 = vpack.c.bf16 %v582_v61, %v581_v60 }
 0x286   : > { %1192 = vmatmul.mubr.bf16.vlgmr.msra.gmra.mxu1 %v583_v62 }
 0x287   : > { %1231 = vmatprep.mubr.msk.bf16.mxu1 %vm1344_vm0, %v1343_v0  ;;  %1216 = vmatpush3.bf16.msra.mxu1 %v1294_v3 }
 0x288   : > { %1217 = vmatprep.subr.bf16.mxu1 %v1343_v0 }
 0x28b   : > { %1218 = vmatpush3.bf16.msra.mxu1 %v1295_v4 }
 0x28c   : > { %1219 = vmatprep.subr.bf16.mxu1 %v1343_v0 }
 0x28f   : > { %1220 = vmatpush3.bf16.msra.mxu1 %v1296_v5 }
 0x290   : > { %1221 = vmatprep.subr.bf16.mxu1 %v1343_v0 }
 0x293   : > { %1222 = vmatpush3.bf16.msra.mxu1 %v1297_v6 }
 0x294   : > { %1223 = vmatprep.subr.bf16.mxu1 %v1343_v0 }
 0x297   : > { %1224 = vmatpush3.bf16.msra.mxu1 %v1298_v7 }
 0x298   : > { %1225 = vmatprep.subr.bf16.mxu1 %v1343_v0 }
 0x29b   : > { %1226 = vmatpush3.bf16.msra.mxu1 %v1299_v18 }
 0x29c   : > { %1227 = vmatprep.subr.bf16.mxu1 %v1343_v0 }
 0x29f   : > { %1228 = vmatpush3.bf16.msra.mxu1 %v1300_v19 }
 0x2a0   : > { %1229 = vmatprep.subr.bf16.mxu1 %v1343_v0 }
 0x2a3   : > { %1230 = vmatpush3.bf16.msra.mxu1 %v1301_v20 }
 0x346   : > { %v691_v9 = vpop.f32.mrf.mxu1 }
 0x347   : > { %v692_v11 = vadd.f32 %v1049_v8, %v691_v9 }
 0x348   : > { %v1193_v10 = vpop.f32.mrf.mxu1 }
 0x349   : > { %v698_v15 = vmax.f32 %v692_v11, 0.0 }
 0x34a   : > { %v694_v12 = vpop.f32.mrf.mxu1 }
 0x34b   : > { %v695_v13 = vadd.f32 %v1049_v8, %v694_v12 }
 0x34c   : > { %v1194_v14 = vpop.f32.mrf.mxu1 }
 0x34d   : > { %v699_v16 = vmax.f32 %v695_v13, 0.0 }
 0x34f   : > { %v700_v17 = vpack.c.bf16 %v699_v16, %v698_v15 }
 0x351   : > { %1212 = vmatmul.mubr.bf16.vlgmr.msra.gmra.mxu0 %v700_v17 }
 0x411   : > { %v808_v25 = vpop.f32.mrf.mxu0 }
 0x412   : > { %v809_v29 = vadd.f32 %v1059_v24, %v808_v25 }
 0x413   : > { %v1213_v0 = vpop.f32.mrf.mxu0 }
 0x414   : > { %v815_v34 = vmax.f32 %v809_v29, 0.0 }
 0x415   : > { %v811_v30 = vpop.f32.mrf.mxu0 }
 0x416   : > { %v812_v32 = vadd.f32 %v1059_v24, %v811_v30 }
 0x417   : > { %v1214_v33 = vpop.f32.mrf.mxu0 }
 0x418   : > { %v816_v35 = vmax.f32 %v812_v32, 0.0 }
 0x41a   : > { %v817_v36 = vpack.c.bf16 %v816_v35, %v815_v34 }
 0x41c   : > { %v828_v37 = vsel %vm827_vm4, %v817_v36, %v700_v17 }
 0x41d   : > { %1232 = vmatmul.mubr.bf16.vlgmr.msra.gmra.mxu1 %v828_v37 }
 0x4dd   : > { %v934_v39 = vpop.f32.mrf.mxu1 }
 0x4de   : > { %v935_v40 = vadd.f32 %v1068_v38, %v934_v39 }
 0x4df   : > { %v1233_v41 = vpop.f32.mrf.mxu1 }
 0x4e0   : > { %942 = vst.msk [vmem:[%s268_s27] sm:$0xff] %vm941_vm5, %v935_v40 }
 0x4e1   : > { %v937_v42 = vpop.f32.mrf.mxu1 }
 0x4e2   : > { %v938_v43 = vadd.f32 %v1068_v38, %v937_v42 }
 0x4e3   : > { %v1234_v44 = vpop.f32.mrf.mxu1 }
 0x4e4   : > { %943 = vst.msk [vmem:[%s268_s27 + $0x8] sm:$0xff] %vm941_vm5, %v938_v43 }
 0x4e5 PF: > { %s17_s21 = sadd.s32 1, %s1338_s21  }
 0x4e6   : > { %p14_p1 = scmp.ge.s32.totalorder %s17_s21, 4  }
 0x4e8   :  { %16 = sbr.rel (!%p14_p1) target bundleno = 1 (0x1), region = 86 }
 0x4ed   :  { %966 = vsyncpa [#allocation3], 1 }
 0x4ee   :  { %968 = vsyncpa [#allocation3 + $0x1], 1 }

</bundles_post_ra>
